<compile_context>
chip_gen: v7x
topology: tpu7x:2x2x1
jax: 0.10.0
libtpu: 0.0.40
codegen_flags: <defaults>
</compile_context>

<pallas_src>
import jax
import jax.numpy as jnp
from jax.experimental import pallas as pl
from jax.experimental.pallas import tpu as pltpu


def _mlp_kernel(x_ref, w1_ref, b1_ref, w2_ref, b2_ref, w3_ref, b3_ref, o_ref):
    # Layer 1: MXU matmul (f32 accumulate) + bias + sigmoid (exp issues on the EUP slot).
    h1 = jnp.dot(x_ref[...], w1_ref[...], preferred_element_type=jnp.float32)
    h1 = jax.nn.sigmoid(h1 + b1_ref[...])          # b1 is (1, H1) -> broadcasts over batch tile
    # Layer 2
    h2 = jnp.dot(h1, w2_ref[...], preferred_element_type=jnp.float32)
    h2 = jax.nn.sigmoid(h2 + b2_ref[...])
    # Output layer (no activation); lane-dense (padded) store.
    out = jnp.dot(h2, w3_ref[...], preferred_element_type=jnp.float32) + b3_ref[...]
    o_ref[...] = out.astype(o_ref.dtype)


def _round_up(n, m):
    return ((n + m - 1) // m) * m


def net_forward(x, w1, b1, w2, b2, w3, b3, *, max_block_batch=256):
    """Full forward pass of Net as a single batched-grid Pallas kernel.

    Operands are zero-padded to MXU/vreg-friendly shapes; zero padding is exact
    (padded feature columns hit zero weight rows, so results are unchanged).
    """
    batch, n_feature = x.shape
    n_h1 = w1.shape[1]
    n_h2 = w2.shape[1]
    n_out = w3.shape[1]

    # Lane-align feature/hidden/output dims; sublane-align / tile the batch.
    f_p = _round_up(n_feature, 128)
    h1_p = _round_up(n_h1, 128)
    h2_p = _round_up(n_h2, 128)
    o_p = _round_up(n_out, 128)
    tb = min(max_block_batch, _round_up(batch, 8))
    b_p = _round_up(batch, tb)
    n_blocks = b_p // tb

    f32 = jnp.float32
    xp = jnp.zeros((b_p, f_p), f32).at[:batch, :n_feature].set(x.astype(f32))
    w1p = jnp.zeros((f_p, h1_p), f32).at[:n_feature, :n_h1].set(w1)
    b1p = jnp.zeros((1, h1_p), f32).at[0, :n_h1].set(b1)
    w2p = jnp.zeros((h1_p, h2_p), f32).at[:n_h1, :n_h2].set(w2)
    b2p = jnp.zeros((1, h2_p), f32).at[0, :n_h2].set(b2)
    w3p = jnp.zeros((h2_p, o_p), f32).at[:n_h2, :n_out].set(w3)
    b3p = jnp.zeros((1, o_p), f32).at[0, :n_out].set(b3)

    # x/out tiled over batch; weights/biases constant across the grid (stay VMEM-resident).
    batch_spec = lambda cols: pl.BlockSpec((tb, cols), lambda i: (i, 0))
    const_spec = lambda a: pl.BlockSpec(a.shape, lambda i: (0,) * a.ndim)

    cost = pl.CostEstimate(
        flops=2 * b_p * (f_p * h1_p + h1_p * h2_p + h2_p * o_p),
        transcendentals=b_p * (h1_p + h2_p),
        bytes_accessed=4 * (b_p * f_p + f_p * h1_p + h1_p * h2_p + h2_p * o_p
                            + h1_p + h2_p + o_p + b_p * o_p),
    )

    out_padded = pl.pallas_call(
        _mlp_kernel,
        out_shape=jax.ShapeDtypeStruct((b_p, o_p), f32),
        grid=(n_blocks,),
        in_specs=[
            batch_spec(f_p),
            const_spec(w1p), const_spec(b1p),
            const_spec(w2p), const_spec(b2p),
            const_spec(w3p), const_spec(b3p),
        ],
        out_specs=batch_spec(o_p),
        compiler_params=pltpu.CompilerParams(
            dimension_semantics=("parallel",),   # shard batch grid across TCs on v7x
        ),
        cost_estimate=cost,
    )(xp, w1p, b1p, w2p, b2p, w3p, b3p)

    # Strip padding (lane-dense slab inside the kernel, exact slice outside).
    return out_padded[:batch, :n_out]


def init_params(key, n_feature, n_hidden1, n_hidden2, n_output):
    """Deterministic init matching torch.nn.Linear shapes (stored transposed: [in, out])."""
    ks = jax.random.split(key, 6)

    def lin(kw, kb, fan_in, fan_out):
        bound = 1.0 / jnp.sqrt(fan_in)
        w = jax.random.uniform(kw, (fan_in, fan_out), jnp.float32, -bound, bound)
        b = jax.random.uniform(kb, (fan_out,), jnp.float32, -bound, bound)
        return w, b

    w1, b1 = lin(ks[0], ks[1], n_feature, n_hidden1)
    w2, b2 = lin(ks[2], ks[3], n_hidden1, n_hidden2)
    w3, b3 = lin(ks[4], ks[5], n_hidden2, n_output)
    return w1, b1, w2, b2, w3, b3


def reference_forward(x, w1, b1, w2, b2, w3, b3):
    h1 = jax.nn.sigmoid(x @ w1 + b1)
    h2 = jax.nn.sigmoid(h1 @ w2 + b2)
    return h2 @ w3 + b3


if __name__ == "__main__":
    key = jax.random.PRNGKey(0)
    k_x, k_p = jax.random.split(key)

    batch, n_feature, n_hidden1, n_hidden2, n_output = 8, 16, 32, 32, 4
    x = jax.random.normal(k_x, (batch, n_feature), jnp.float32)
    params = init_params(k_p, n_feature, n_hidden1, n_hidden2, n_output)

    out = net_forward(x, *params)
    out = jax.block_until_ready(out)

    ref = reference_forward(x, *params)
    assert out.shape == (batch, n_output)
    assert jnp.allclose(out, ref, atol=1e-5, rtol=1e-5), "mismatch vs reference"
    print("KERNEL_OK")
</pallas_src>

<mosaic_0001>
module attributes {stable_mosaic.version = 11 : i64} {
  func.func @_mlp_kernel(%arg0: i32, %arg1: memref<8x128xf32, #tpu.memory_space<vmem>>, %arg2: memref<128x128xf32, #tpu.memory_space<vmem>>, %arg3: memref<1x128xf32, #tpu.memory_space<vmem>>, %arg4: memref<128x128xf32, #tpu.memory_space<vmem>>, %arg5: memref<1x128xf32, #tpu.memory_space<vmem>>, %arg6: memref<128x128xf32, #tpu.memory_space<vmem>>, %arg7: memref<1x128xf32, #tpu.memory_space<vmem>>, %arg8: memref<8x128xf32, #tpu.memory_space<vmem>>) attributes {dimension_semantics = [#tpu.dimension_semantics<parallel>], iteration_bounds = array<i64: 1>, scalar_prefetch = 0 : i64, scratch_operands = 0 : i64, tpu.core_type = #tpu.core_type<tc>, window_params = [{transform_indices = @transform_0, window_bounds = array<i64: 8, 128>}, {pipeline_mode = #tpu.pipeline_mode<synchronous>, transform_indices = @transform_1, window_bounds = array<i64: 128, 128>}, {pipeline_mode = #tpu.pipeline_mode<synchronous>, transform_indices = @transform_2, window_bounds = array<i64: 1, 128>}, {pipeline_mode = #tpu.pipeline_mode<synchronous>, transform_indices = @transform_3, window_bounds = array<i64: 128, 128>}, {pipeline_mode = #tpu.pipeline_mode<synchronous>, transform_indices = @transform_4, window_bounds = array<i64: 1, 128>}, {pipeline_mode = #tpu.pipeline_mode<synchronous>, transform_indices = @transform_5, window_bounds = array<i64: 128, 128>}, {pipeline_mode = #tpu.pipeline_mode<synchronous>, transform_indices = @transform_6, window_bounds = array<i64: 1, 128>}, {transform_indices = @transform_7, window_bounds = array<i64: 8, 128>}]} {
    %c0 = arith.constant 0 : index
    %c0_0 = arith.constant 0 : index
    %0 = vector.load %arg1[%c0, %c0_0] : memref<8x128xf32, #tpu.memory_space<vmem>>, vector<8x128xf32>
    %c0_1 = arith.constant 0 : index
    %c0_2 = arith.constant 0 : index
    %1 = vector.load %arg2[%c0_1, %c0_2] : memref<128x128xf32, #tpu.memory_space<vmem>>, vector<128x128xf32>
    %cst = arith.constant dense<0.000000e+00> : vector<8x128xf32>
    %2 = tpu.matmul %0, %1, %cst {dimension_numbers = #tpu.dot_dimension_numbers<[1], [0], [0], [1], [0, 0, 1, 1], [], []>} : vector<8x128xf32>, vector<128x128xf32>, vector<8x128xf32> -> vector<8x128xf32>
    %c0_3 = arith.constant 0 : index
    %c0_4 = arith.constant 0 : index
    %3 = vector.load %arg3[%c0_3, %c0_4] : memref<1x128xf32, #tpu.memory_space<vmem>>, vector<1x128xf32>
    %4 = vector.broadcast %3 : vector<1x128xf32> to vector<8x128xf32>
    %5 = arith.addf %2, %4 : vector<8x128xf32>
    %6 = arith.negf %5 : vector<8x128xf32>
    %7 = math.exp %6 : vector<8x128xf32>
    %cst_5 = arith.constant 1.000000e+00 : f32
    %8 = vector.broadcast %cst_5 : f32 to vector<8x128xf32>
    %9 = arith.addf %8, %7 : vector<8x128xf32>
    %10 = arith.divf %8, %9 : vector<8x128xf32>
    %c0_6 = arith.constant 0 : index
    %c0_7 = arith.constant 0 : index
    %11 = vector.load %arg4[%c0_6, %c0_7] : memref<128x128xf32, #tpu.memory_space<vmem>>, vector<128x128xf32>
    %cst_8 = arith.constant dense<0.000000e+00> : vector<8x128xf32>
    %12 = tpu.matmul %10, %11, %cst_8 {dimension_numbers = #tpu.dot_dimension_numbers<[1], [0], [0], [1], [0, 0, 1, 1], [], []>} : vector<8x128xf32>, vector<128x128xf32>, vector<8x128xf32> -> vector<8x128xf32>
    %c0_9 = arith.constant 0 : index
    %c0_10 = arith.constant 0 : index
    %13 = vector.load %arg5[%c0_9, %c0_10] : memref<1x128xf32, #tpu.memory_space<vmem>>, vector<1x128xf32>
    %14 = vector.broadcast %13 : vector<1x128xf32> to vector<8x128xf32>
    %15 = arith.addf %12, %14 : vector<8x128xf32>
    %16 = arith.negf %15 : vector<8x128xf32>
    %17 = math.exp %16 : vector<8x128xf32>
    %cst_11 = arith.constant 1.000000e+00 : f32
    %18 = vector.broadcast %cst_11 : f32 to vector<8x128xf32>
    %19 = arith.addf %18, %17 : vector<8x128xf32>
    %20 = arith.divf %18, %19 : vector<8x128xf32>
    %c0_12 = arith.constant 0 : index
    %c0_13 = arith.constant 0 : index
    %21 = vector.load %arg6[%c0_12, %c0_13] : memref<128x128xf32, #tpu.memory_space<vmem>>, vector<128x128xf32>
    %cst_14 = arith.constant dense<0.000000e+00> : vector<8x128xf32>
    %22 = tpu.matmul %20, %21, %cst_14 {dimension_numbers = #tpu.dot_dimension_numbers<[1], [0], [0], [1], [0, 0, 1, 1], [], []>} : vector<8x128xf32>, vector<128x128xf32>, vector<8x128xf32> -> vector<8x128xf32>
    %c0_15 = arith.constant 0 : index
    %c0_16 = arith.constant 0 : index
    %23 = vector.load %arg7[%c0_15, %c0_16] : memref<1x128xf32, #tpu.memory_space<vmem>>, vector<1x128xf32>
    %24 = vector.broadcast %23 : vector<1x128xf32> to vector<8x128xf32>
    %25 = arith.addf %22, %24 : vector<8x128xf32>
    %c0_17 = arith.constant 0 : index
    %c0_18 = arith.constant 0 : index
    %26 = vector.load %arg8[%c0_17, %c0_18] : memref<8x128xf32, #tpu.memory_space<vmem>>, vector<8x128xf32>
    tpu.vector_store %arg8[%c0_17, %c0_18], %25 {strides = array<i32>} : memref<8x128xf32, #tpu.memory_space<vmem>>, vector<8x128xf32>,
    return
  }
  func.func @transform_0(%arg0: i32) -> (i32, i32) {
    %c0_i32 = arith.constant 0 : i32
    %c0_i32_0 = arith.constant 0 : i32
    return %arg0, %c0_i32 : i32, i32
  }
  func.func @transform_1(%arg0: i32) -> (i32, i32) {
    %c0_i32 = arith.constant 0 : i32
    %c0_i32_0 = arith.constant 0 : i32
    %c0_i32_1 = arith.constant 0 : i32
    return %c0_i32, %c0_i32_0 : i32, i32
  }
  func.func @transform_2(%arg0: i32) -> (i32, i32) {
    %c0_i32 = arith.constant 0 : i32
    %c0_i32_0 = arith.constant 0 : i32
    %c0_i32_1 = arith.constant 0 : i32
    return %c0_i32, %c0_i32_0 : i32, i32
  }
  func.func @transform_3(%arg0: i32) -> (i32, i32) {
    %c0_i32 = arith.constant 0 : i32
    %c0_i32_0 = arith.constant 0 : i32
    %c0_i32_1 = arith.constant 0 : i32
    return %c0_i32, %c0_i32_0 : i32, i32
  }
  func.func @transform_4(%arg0: i32) -> (i32, i32) {
    %c0_i32 = arith.constant 0 : i32
    %c0_i32_0 = arith.constant 0 : i32
    %c0_i32_1 = arith.constant 0 : i32
    return %c0_i32, %c0_i32_0 : i32, i32
  }
  func.func @transform_5(%arg0: i32) -> (i32, i32) {
    %c0_i32 = arith.constant 0 : i32
    %c0_i32_0 = arith.constant 0 : i32
    %c0_i32_1 = arith.constant 0 : i32
    return %c0_i32, %c0_i32_0 : i32, i32
  }
  func.func @transform_6(%arg0: i32) -> (i32, i32) {
    %c0_i32 = arith.constant 0 : i32
    %c0_i32_0 = arith.constant 0 : i32
    %c0_i32_1 = arith.constant 0 : i32
    return %c0_i32, %c0_i32_0 : i32, i32
  }
  func.func @transform_7(%arg0: i32) -> (i32, i32) {
    %c0_i32 = arith.constant 0 : i32
    %c0_i32_0 = arith.constant 0 : i32
    return %arg0, %c0_i32 : i32, i32
  }
}

</mosaic_0001>

<bundles_post_ra>
// kernel: tpu_custom_call.1
= control target key start
LH: loop header
LB: loop body
LE: loop exit
PB: predicated region body
PF: predicated region fallthrough
CT: control target
= control target key end

     0   :  { %12 = vsyncpa [#allocation3], 0  ;;  %s914_s0 = inlined_call_operand.hbm [shape: f32[8,128], index: 0, kind: input, shape index: {}]   ;;  %s915_s1 = inlined_call_operand.hbm [shape: f32[128,128], index: 1, kind: input, shape index: {}]   ;;  %s916_s2 = inlined_call_operand.vmem [shape: f32[1,128], index: 2, kind: input, shape index: {}]   ;;  %s917_s3 = inlined_call_operand.hbm [shape: f32[128,128], index: 3, kind: input, shape index: {}]   ;;  %s918_s4 = inlined_call_operand.vmem [shape: f32[1,128], index: 4, kind: input, shape index: {}]   ;;  %s919_s5 = inlined_call_operand.hbm [shape: f32[128,128], index: 5, kind: input, shape index: {}]   ;;  %s920_s6 = inlined_call_operand.vmem [shape: f32[1,128], index: 6, kind: input, shape index: {}]   ;;  %s921_s7 = inlined_call_operand.hbm [shape: f32[8,128], index: 7, kind: output, shape index: {}]  }
   0x1   :  { %13 = vsyncpa [#allocation6], 0 }
   0x2   :  { %14 = vsyncpa [#allocation9], 0 }
   0x3   :  { %15 = vsyncpa [#allocation4], 0  ;;  %s759_s24 = smov [#allocation5]   ;;  %s641_s28 = scalar_lea.hbm %s915_s1, 2048 }
   0x4   :  { %s31_s25 = sshll.u32 %s759_s24, 4  ;;  %p642_p0 = scmp.ne.s32.totalorder %s915_s1, %s641_s28  ;;  %s32_s25 = int_to_ptr.vmem [resolvable:$true] %s31_s25 }
   0x5   :  { %p645_p1 = scmp.lt.u32.totalorder %s641_s28, %s915_s1 }
   0x7   :  { %p647_p2 = pnand %p645_p1, %p642_p0 }
   0x9   :  { %650 = shalt.err (!%p647_p2)
}
   0xa   :  { %s651_s10 = scalar_lea.vmem %s32_s25, 2048  ;;  %p656_p4 = scmp.lt.s32.totalorder %s32_s25, %s32_s25 }
   0xb   :  { %p652_p3 = scmp.ne.s32.totalorder %s32_s25, %s651_s10  ;;  %p657_p5 = scmp.lt.s32.totalorder %s651_s10, %s651_s10 }
   0xd   :  { %p658_p6 = por %p657_p5, %p656_p4 }
   0xf   :  { %p659_p7 = pnand %p658_p6, %p652_p3 }
  0x11   :  { %662 = shalt.err (!%p659_p7)
}
  0x12   :  { %s760_s11 = smov 128   ;;  %s761_s12 = smov 8  }
  0x13   :  { %37 = dma.hbm_to_vmem [thread:$0]  %s915_s1, 2048, %s32_s25, [#allocation6], %s760_s11, %s760_s11, %s761_s12  }
  0x14   :  { %s762_s15 = smov [#allocation2]   ;;  %s763_s17 = smov [#allocation7]  }
  0x15   :  { %s22_s16 = sshll.u32 %s762_s15, 4  ;;  %s45_s18 = sshll.u32 %s763_s17, 4  ;;  %s23_s16 = int_to_ptr.vmem [resolvable:$true] %s22_s16  ;;  %s46_s18 = int_to_ptr.vmem [resolvable:$true] %s45_s18 }
  0x16   :  { %s663_s21 = scalar_lea.hbm %s914_s0, 128 }
  0x17   :  { %p664_p8 = scmp.ne.s32.totalorder %s914_s0, %s663_s21  ;;  %p667_p9 = scmp.lt.u32.totalorder %s663_s21, %s914_s0 }
  0x19   :  { %p669_p10 = pnand %p667_p9, %p664_p8 }
  0x1b   :  { %672 = shalt.err (!%p669_p10)
}
  0x1c   :  { %s673_s1 = scalar_lea.vmem %s23_s16, 128  ;;  %p678_p12 = scmp.lt.s32.totalorder %s23_s16, %s23_s16 }
  0x1d   :  { %p674_p11 = scmp.ne.s32.totalorder %s23_s16, %s673_s1  ;;  %p679_p13 = scmp.lt.s32.totalorder %s673_s1, %s673_s1 }
  0x1f   :  { %p680_p0 = por %p679_p13, %p678_p12 }
  0x21   :  { %p681_p1 = pnand %p680_p0, %p674_p11 }
  0x23   :  { %684 = shalt.err (!%p681_p1)
}
  0x24   :  { %25 = dma.hbm_to_vmem [thread:$0]  %s914_s0, 128, %s23_s16, [#allocation3]  }
  0x25   :  { %s685_s30 = scalar_lea.hbm %s917_s3, 2048 }
  0x26   :  { %p686_p2 = scmp.ne.s32.totalorder %s917_s3, %s685_s30  ;;  %p689_p3 = scmp.lt.u32.totalorder %s685_s30, %s917_s3 }
  0x28   :  { %p691_p4 = pnand %p689_p3, %p686_p2 }
  0x2a   :  { %694 = shalt.err (!%p691_p4)
}
  0x2b   :  { %s695_s14 = scalar_lea.vmem %s46_s18, 2048  ;;  %p700_p6 = scmp.lt.s32.totalorder %s46_s18, %s46_s18 }
  0x2c   :  { %p696_p5 = scmp.ne.s32.totalorder %s46_s18, %s695_s14  ;;  %p701_p7 = scmp.lt.s32.totalorder %s695_s14, %s695_s14 }
  0x2e   :  { %p702_p8 = por %p701_p7, %p700_p6 }
  0x30   :  { %p703_p9 = pnand %p702_p8, %p696_p5 }
  0x32   :  { %706 = shalt.err (!%p703_p9)
}
  0x33   :  { %51 = dma.hbm_to_vmem [thread:$0]  %s917_s3, 2048, %s46_s18, [#allocation6], %s760_s11, %s760_s11, %s761_s12  }
  0x34   :  { %s764_s16 = smov [#allocation8]   ;;  %s707_s21 = scalar_lea.hbm %s919_s5, 2048 }
  0x35   :  { %s59_s17 = sshll.u32 %s764_s16, 4  ;;  %p708_p10 = scmp.ne.s32.totalorder %s919_s5, %s707_s21  ;;  %s60_s17 = int_to_ptr.vmem [resolvable:$true] %s59_s17 }
  0x36   :  { %p711_p11 = scmp.lt.u32.totalorder %s707_s21, %s919_s5 }
  0x38   :  { %p713_p12 = pnand %p711_p11, %p708_p10 }
  0x3a   :  { %716 = shalt.err (!%p713_p12)
}
  0x3b   :  { %s717_s1 = scalar_lea.vmem %s60_s17, 2048  ;;  %p722_p0 = scmp.lt.s32.totalorder %s60_s17, %s60_s17 }
  0x3c   :  { %p718_p13 = scmp.ne.s32.totalorder %s60_s17, %s717_s1  ;;  %p723_p1 = scmp.lt.s32.totalorder %s717_s1, %s717_s1 }
  0x3e   :  { %p724_p2 = por %p723_p1, %p722_p0 }
  0x40   :  { %p725_p3 = pnand %p724_p2, %p718_p13 }
  0x42   :  { %728 = shalt.err (!%p725_p3)
}
  0x43   :  { %65 = dma.hbm_to_vmem [thread:$0]  %s919_s5, 2048, %s60_s17, [#allocation9], %s760_s11, %s760_s11, %s761_s12  }
  0x44   :  { %751 = dma.done.wait [#allocation3], 128  }
  0x45   :  { %752 = vsyncadd [#allocation3], 4294967168 }
  0x46   :  { %753 = dma.done.wait [#allocation6], 4096  }
  0x47   :  { %754 = vsyncadd [#allocation6], 4294963200 }
  0x48   :  { %755 = dma.done.wait [#allocation9], 2048  }
  0x49   :  { %756 = vsyncadd [#allocation9], 4294965248  ;;  %v765_v0 = vmov 0.0|0.0   ;;  %vm766_vm0 = vmmov 0   ;;  %v767_v1 = vmov 0.0   ;;  %v81_v2 = vld [vmem:[#allocation5] sm:$0xff] }
  0x4a   :  { %551 = vmatprep.subr.bf16.mxu0 %v765_v0  ;;  %478 = vmatprep.mubr.msk.f32.mxu0 %vm766_vm0, %v767_v1  ;;  %v82_v3 = vld [vmem:[#allocation5 + $0x8] sm:$0xff]  ;;  %v83_v4 = vld [vmem:[#allocation5 + $0x10] sm:$0xff]  ;;  %v84_v6 = vld [vmem:[#allocation5 + $0x18] sm:$0xff]  ;;  %s768_s28 = smov [#allocation10]  }
  0x4b   :  { %575 = vmatprep.subr.bf16.mxu1 %v765_v0  ;;  %513 = vmatprep.mubr.msk.f32.mxu1 %vm766_vm0, %v767_v1  ;;  %v552_v5 = vpack.c.bf16 %v82_v3, %v81_v2  ;;  %v555_v7 = vpack.c.bf16 %v84_v6, %v83_v4  ;;  %v85_v8 = vld [vmem:[#allocation5 + $0x20] sm:$0xff]  ;;  %v86_v9 = vld [vmem:[#allocation5 + $0x28] sm:$0xff]  ;;  %v87_v14 = vld [vmem:[#allocation5 + $0x30] sm:$0xff]  ;;  %s379_s29 = sshll.u32 %s768_s28, 4  ;;  %s380_s29 = int_to_ptr.vmem [resolvable:$true] %s379_s29 }
  0x4c   :  { %v180_v10 = vld [vmem:[#allocation7] sm:$0xff]  ;;  %v181_v11 = vld [vmem:[#allocation7 + $0x8] sm:$0xff]  ;;  %v558_v12 = vpack.c.bf16 %v86_v9, %v85_v8  ;;  %v88_v15 = vld [vmem:[#allocation5 + $0x38] sm:$0xff]  ;;  %p734_p5 = scmp.lt.s32.totalorder %s380_s29, %s380_s29 }
  0x4d   :  { %553 = vmatpush3.bf16.msra.mxu0 %v552_v5  ;;  %v576_v13 = vpack.c.bf16 %v181_v11, %v180_v10  ;;  %v561_v16 = vpack.c.bf16 %v88_v15, %v87_v14  ;;  %v89_v17 = vld [vmem:[#allocation5 + $0x40] sm:$0xff]  ;;  %v90_v18 = vld [vmem:[#allocation5 + $0x48] sm:$0xff]  ;;  %v91_v20 = vld [vmem:[#allocation5 + $0x50] sm:$0xff] }
  0x4e   :  { %554 = vmatprep.subr.bf16.mxu0 %v765_v0  ;;  %v564_v19 = vpack.c.bf16 %v90_v18, %v89_v17  ;;  %v92_v21 = vld [vmem:[#allocation5 + $0x58] sm:$0xff]  ;;  %v93_v23 = vld [vmem:[#allocation5 + $0x60] sm:$0xff]  ;;  %v94_v24 = vld [vmem:[#allocation5 + $0x68] sm:$0xff] }
  0x4f   :  { %577 = vmatpush3.bf16.msra.mxu1 %v576_v13  ;;  %v567_v22 = vpack.c.bf16 %v92_v21, %v91_v20  ;;  %v570_v25 = vpack.c.bf16 %v94_v24, %v93_v23  ;;  %v95_v26 = vld [vmem:[#allocation5 + $0x70] sm:$0xff]  ;;  %v96_v27 = vld [vmem:[#allocation5 + $0x78] sm:$0xff]  ;;  %v184_v33 = vld [vmem:[#allocation7 + $0x20] sm:$0xff] }
  0x50   :  { %578 = vmatprep.subr.bf16.mxu1 %v765_v0  ;;  %v573_v28 = vpack.c.bf16 %v96_v27, %v95_v26  ;;  %v80_v29 = vld [vmem:[#allocation2] sm:$0xff]  ;;  %v182_v30 = vld [vmem:[#allocation7 + $0x10] sm:$0xff]  ;;  %v185_v34 = vld [vmem:[#allocation7 + $0x28] sm:$0xff] }
  0x51   :  { %556 = vmatpush3.bf16.msra.mxu0 %v555_v7  ;;  %v183_v31 = vld [vmem:[#allocation7 + $0x18] sm:$0xff]  ;;  %v582_v35 = vpack.c.bf16 %v185_v34, %v184_v33  ;;  %v186_v36 = vld [vmem:[#allocation7 + $0x30] sm:$0xff]  ;;  %v188_v39 = vld [vmem:[#allocation7 + $0x40] sm:$0xff] }
  0x52   :  { %557 = vmatprep.subr.bf16.mxu0 %v765_v0  ;;  %v579_v32 = vpack.c.bf16 %v183_v31, %v182_v30  ;;  %v187_v37 = vld [vmem:[#allocation7 + $0x38] sm:$0xff]  ;;  %v189_v40 = vld [vmem:[#allocation7 + $0x48] sm:$0xff]  ;;  %v190_v42 = vld [vmem:[#allocation7 + $0x50] sm:$0xff] }
  0x53   :  { %v585_v38 = vpack.c.bf16 %v187_v37, %v186_v36  ;;  %v588_v41 = vpack.c.bf16 %v189_v40, %v188_v39  ;;  %v191_v43 = vld [vmem:[#allocation7 + $0x58] sm:$0xff]  ;;  %v192_v45 = vld [vmem:[#allocation7 + $0x60] sm:$0xff]  ;;  %v193_v46 = vld [vmem:[#allocation7 + $0x68] sm:$0xff] }
  0x54   :  { %580 = vmatpush3.bf16.msra.mxu1 %v579_v32  ;;  %v591_v44 = vpack.c.bf16 %v191_v43, %v190_v42  ;;  %v594_v47 = vpack.c.bf16 %v193_v46, %v192_v45  ;;  %v194_v48 = vld [vmem:[#allocation7 + $0x70] sm:$0xff]  ;;  %v195_v49 = vld [vmem:[#allocation7 + $0x78] sm:$0xff]  ;;  %v279_v51 = vld [vmem:[#allocation8] sm:$0xff] }
  0x55   :  { %559 = vmatpush3.bf16.msra.mxu0 %v558_v12  ;;  %581 = vmatprep.subr.bf16.mxu1 %v765_v0  ;;  %v597_v50 = vpack.c.bf16 %v195_v49, %v194_v48  ;;  %v280_v52 = vld [vmem:[#allocation8 + $0x8] sm:$0xff]  ;;  %v390_v54 = vld [vmem:[%s916_s2] ss:$0 sm:$0xff]  ;;  %v281_v62 = vld [vmem:[#allocation8 + $0x10] sm:$0xff] }
  0x56   :  { %560 = vmatprep.subr.bf16.mxu0 %v765_v0  ;;  %v600_v53 = vpack.c.bf16 %v280_v52, %v279_v51  ;;  %v282_v63 = vld [vmem:[#allocation8 + $0x18] sm:$0xff]  ;;  %v283_v2 = vld [vmem:[#allocation8 + $0x20] sm:$0xff]  ;;  %v284_v3 = vld [vmem:[#allocation8 + $0x28] sm:$0xff] }
  0x57   :  { %v606_v4 = vpack.c.bf16 %v284_v3, %v283_v2  ;;  %v285_v5 = vld [vmem:[#allocation8 + $0x30] sm:$0xff]  ;;  %v286_v6 = vld [vmem:[#allocation8 + $0x38] sm:$0xff]  ;;  %v287_v8 = vld [vmem:[#allocation8 + $0x40] sm:$0xff] }
  0x58   :  { %583 = vmatpush3.bf16.msra.mxu1 %v582_v35  ;;  %v609_v7 = vpack.c.bf16 %v286_v6, %v285_v5  ;;  %v288_v9 = vld [vmem:[#allocation8 + $0x48] sm:$0xff]  ;;  %v289_v11 = vld [vmem:[#allocation8 + $0x50] sm:$0xff]  ;;  %v290_v12 = vld [vmem:[#allocation8 + $0x58] sm:$0xff] }
  0x59   :  { %562 = vmatpush3.bf16.msra.mxu0 %v561_v16  ;;  %584 = vmatprep.subr.bf16.mxu1 %v765_v0  ;;  %v612_v10 = vpack.c.bf16 %v288_v9, %v287_v8  ;;  %v615_v13 = vpack.c.bf16 %v290_v12, %v289_v11  ;;  %v291_v14 = vld [vmem:[#allocation8 + $0x60] sm:$0xff]  ;;  %v292_v15 = vld [vmem:[#allocation8 + $0x68] sm:$0xff]  ;;  %v293_v17 = vld [vmem:[#allocation8 + $0x70] sm:$0xff] }
  0x5a   :  { %563 = vmatprep.subr.bf16.mxu0 %v765_v0  ;;  %v618_v16 = vpack.c.bf16 %v292_v15, %v291_v14  ;;  %v294_v18 = vld [vmem:[#allocation8 + $0x78] sm:$0xff] }
  0x5b   :  { %v392_v20 = vld [vmem:[%s918_s4] ss:$0 sm:$0xff]  ;;  %s729_s4 = scalar_lea.vmem %s380_s29, 128 }
  0x5c   :  { %586 = vmatpush3.bf16.msra.mxu1 %v585_v38  ;;  %p730_p4 = scmp.ne.s32.totalorder %s380_s29, %s729_s4  ;;  %p735_p6 = scmp.lt.s32.totalorder %s729_s4, %s729_s4 }
  0x5d   :  { %565 = vmatpush3.bf16.msra.mxu0 %v564_v19  ;;  %587 = vmatprep.subr.bf16.mxu1 %v765_v0  ;;  %v621_v19 = vpack.c.bf16 %v294_v18, %v293_v17 }
  0x5e   :  { %566 = vmatprep.subr.bf16.mxu0 %v765_v0  ;;  %p736_p7 = por %p735_p6, %p734_p5 }
  0x60   :  { %589 = vmatpush3.bf16.msra.mxu1 %v588_v41  ;;  %p737_p8 = pnand %p736_p7, %p730_p4 }
  0x61   :  { %568 = vmatpush3.bf16.msra.mxu0 %v567_v22  ;;  %590 = vmatprep.subr.bf16.mxu1 %v765_v0 }
  0x62   :  { %569 = vmatprep.subr.bf16.mxu0 %v765_v0 }
  0x64   :  { %592 = vmatpush3.bf16.msra.mxu1 %v591_v44 }
  0x65   :  { %571 = vmatpush3.bf16.msra.mxu0 %v570_v25  ;;  %593 = vmatprep.subr.bf16.mxu1 %v765_v0 }
  0x66   :  { %572 = vmatprep.subr.bf16.mxu0 %v765_v0 }
  0x68   :  { %595 = vmatpush3.bf16.msra.mxu1 %v594_v47 }
  0x69   :  { %574 = vmatpush3.bf16.msra.mxu0 %v573_v28  ;;  %596 = vmatprep.subr.bf16.mxu1 %v765_v0  ;;  %v394_v28 = vld [vmem:[%s920_s6] ss:$0 sm:$0xff] }
  0x6a   :  { %599 = vmatprep.subr.bf16.mxu0 %v765_v0 }
  0x6c   :  { %479 = vmatmul.mubr.f32.vlgmr.msra.gmra.mrb[0].mxu0 %v80_v29  ;;  %598 = vmatpush3.bf16.msra.mxu1 %v597_v50 }
  0x6d   :  { %548 = vmatprep.mubr.msk.f32.mxu0 %vm766_vm0, %v767_v1  ;;  %601 = vmatpush3.bf16.msra.mxu0 %v600_v53  ;;  %v603_v1 = vpack.c.bf16 %v282_v63, %v281_v62 }
  0x6e   :  { %602 = vmatprep.subr.bf16.mxu0 %v765_v0 }
  0x71   :  { %604 = vmatpush3.bf16.msra.mxu0 %v603_v1 }
  0x72   :  { %605 = vmatprep.subr.bf16.mxu0 %v765_v0 }
  0x75   :  { %607 = vmatpush3.bf16.msra.mxu0 %v606_v4 }
  0x76   :  { %608 = vmatprep.subr.bf16.mxu0 %v765_v0 }
  0x79   :  { %610 = vmatpush3.bf16.msra.mxu0 %v609_v7 }
  0x7a   :  { %611 = vmatprep.subr.bf16.mxu0 %v765_v0 }
  0x7d   :  { %613 = vmatpush3.bf16.msra.mxu0 %v612_v10 }
  0x7e   :  { %614 = vmatprep.subr.bf16.mxu0 %v765_v0 }
  0x81   :  { %616 = vmatpush3.bf16.msra.mxu0 %v615_v13 }
  0x82   :  { %617 = vmatprep.subr.bf16.mxu0 %v765_v0 }
  0x85   :  { %619 = vmatpush3.bf16.msra.mxu0 %v618_v16 }
  0x86   :  { %620 = vmatprep.subr.bf16.mxu0 %v765_v0 }
  0x89   :  { %622 = vmatpush3.bf16.msra.mxu0 %v621_v19 }
 0x13f   :  { %v170_v55 = vpop.f32.mrb[0].mxu0 }
 0x140   :  { %v171_v56 = vadd.f32 %v390_v54, %v170_v55  ;;  %v480_v57 = vpop.f32.mrb[1].mxu0 }
 0x142   :  { %v391_v58 = vmul.f32 -1.442695, %v171_v56 }
 0x144   :  { %633 = vpow2.f32 %v391_v58 }
 0x14e   :  { %v634_v59 = vpop.eup %633 }
 0x14f   :  { %v177_v60 = vadd.f32 1.0, %v634_v59 }
 0x151   :  { %635 = vrcp.f32 %v177_v60 }
 0x15b   :  { %v636_v61 = vpop.eup %635 }
 0x15c   :  { %514 = vmatmul.mubr.f32.vlgmr.msra.gmra.mrb[0].mxu1 %v636_v61 }
 0x22f   :  { %v269_v21 = vpop.f32.mrb[0].mxu1 }
 0x230   :  { %v270_v22 = vadd.f32 %v392_v20, %v269_v21  ;;  %v515_v23 = vpop.f32.mrb[1].mxu1 }
 0x232   :  { %v393_v24 = vmul.f32 -1.442695, %v270_v22 }
 0x234   :  { %637 = vpow2.f32 %v393_v24 }
 0x23e   :  { %v638_v25 = vpop.eup %637 }
 0x23f   :  { %v276_v26 = vadd.f32 1.0, %v638_v25 }
 0x241   :  { %639 = vrcp.f32 %v276_v26 }
 0x24b   :  { %v640_v27 = vpop.eup %639 }
 0x24c   :  { %549 = vmatmul.mubr.f32.vlgmr.msra.gmra.mrb[2].mxu0 %v640_v27 }
 0x31f   :  { %v368_v0 = vpop.f32.mrb[2].mxu0 }
 0x320   :  { %v369_v29 = vadd.f32 %v394_v28, %v368_v0  ;;  %v550_v30 = vpop.f32.mrb[3].mxu0 }
 0x322   :  { %372 = vst [vmem:[#allocation10] sm:$0xff] %v369_v29 }
 0x323   :  { %740 = shalt.err (!%p737_p8)
}
 0x324   :  { %s741_s9 = scalar_lea.hbm %s921_s7, 128 }
 0x325   :  { %p742_p9 = scmp.ne.s32.totalorder %s921_s7, %s741_s9  ;;  %p745_p10 = scmp.lt.u32.totalorder %s741_s9, %s921_s7 }
 0x327   :  { %p747_p11 = pnand %p745_p10, %p742_p9 }
 0x329   :  { %750 = shalt.err (!%p747_p11)
}
 0x32a   :  { %382 = dma.vmem_to_hbm [thread:$0]  %s380_s29, 128, %s921_s7, [#allocation4]  }
 0x32b   :  { %757 = dma.done.wait [#allocation4], 128  }
 0x32c   :  { %758 = vsyncadd [#allocation4], 4294967168 }
 0x32d   :  { %386 = vsyncpa [#allocation3], 1 }
 0x32e   :  { %387 = vsyncpa [#allocation6], 1 }
 0x32f   :  { %388 = vsyncpa [#allocation9], 1 }
 0x330   :  { %389 = vsyncpa [#allocation4], 1 }

</bundles_post_ra>
